<compile_context>
chip_gen: v7x
topology: tpu7x:2x2x1
jax: 0.10.0
libtpu: 0.0.40
codegen_flags: <defaults>
</compile_context>

<pallas_src>
import functools

import jax
import jax.numpy as jnp
from jax import lax
from jax.experimental import pallas as pl
from jax.experimental.pallas import tpu as pltpu

GAMMA = 2.0


def _round_up(a, b):
    return (a + b - 1) // b * b


def _choose_block_n(n, c, itemsize):
    # sublane packing: f32 -> 8 rows/vreg, bf16 -> 16, int8/fp8 -> 32
    pack = max(8, 32 // max(int(itemsize), 1))
    # ~1 MiB of streamed input per grid step amortizes the ~0.35 us/step
    # overhead; cap so the f32 working set (double-buffered) stays well below
    # the scoped-VMEM limit even for wide C.
    rows = (1 << 20) // max(c * int(itemsize), 1)
    rows = min(max(rows, pack), 4096, _round_up(n, pack))
    return max(pack, (rows // pack) * pack)


def _focal_loss_kernel(x_ref, t_ref, out_ref, *, block_n, n_total, gamma,
                       needs_mask):
    i = pl.program_id(0)

    x = x_ref[...].astype(jnp.float32)                  # (TN, C)
    t = t_ref[...]                                      # (TN, 1) int32

    # log-sum-exp over the class (lane) axis: the only full-tile transcendental.
    m = jnp.max(x, axis=1, keepdims=True)               # (TN, 1)  XLU reduce
    z = x - m
    sum_ez = jnp.sum(jnp.exp(z), axis=1, keepdims=True)  # (TN, 1)  EUP + XLU
    lse = jnp.log(sum_ez)                               # (TN, 1)

    # Gather z at the target class BEFORE the focal transform so the
    # exp / square / multiply chain runs on (TN, 1), not (TN, C).
    col = lax.broadcasted_iota(jnp.int32, z.shape, 1)
    z_t = jnp.sum(jnp.where(col == t, z, 0.0), axis=1, keepdims=True)  # (TN, 1)

    logpt_t = z_t - lse                                 # log_softmax at target
    pt_t = jnp.exp(logpt_t)                             # (TN, 1)
    om = 1.0 - pt_t
    if float(gamma) == 2.0:
        w = om * om                                     # VPU square, not EUP pow
    else:
        w = om ** jnp.float32(gamma)                    # tiny (TN,1) pow
    focal_t = w * logpt_t                               # (TN, 1)

    if needs_mask:
        # Mask padded rows (ragged N); compiled out when N % block_n == 0.
        row = lax.broadcasted_iota(jnp.int32, focal_t.shape, 0) + i * block_n
        focal_t = jnp.where(row < n_total, focal_t, 0.0)

    # Emit this block's partial sum.
    partial = -jnp.sum(focal_t, axis=(0, 1), keepdims=True)  # (1, 1)
    out_ref[0] = partial


def multiclass_focal_loss(x, target, gamma=GAMMA, block_n=None):
    """x: [N, C] float logits, target: [N] int class indices -> scalar mean focal loss."""
    n, c = x.shape
    if block_n is None:
        block_n = _choose_block_n(n, c, jnp.dtype(x.dtype).itemsize)

    n_pad = _round_up(n, block_n)
    if n_pad != n:
        x = jnp.pad(x, ((0, n_pad - n), (0, 0)))
        target = jnp.pad(target, (0, n_pad - n))
    t2d = target.astype(jnp.int32).reshape(n_pad, 1)
    grid = n_pad // block_n

    kernel = functools.partial(
        _focal_loss_kernel,
        block_n=block_n,
        n_total=n,
        gamma=gamma,
        needs_mask=(n_pad != n),
    )

    partials = pl.pallas_call(
        kernel,
        out_shape=jax.ShapeDtypeStruct((grid, 1, 1), jnp.float32),
        grid_spec=pltpu.PrefetchScalarGridSpec(
            num_scalar_prefetch=0,
            grid=(grid,),
            in_specs=[
                pl.BlockSpec((block_n, c), lambda i: (i, 0)),
                pl.BlockSpec((block_n, 1), lambda i: (i, 0)),
            ],
            out_specs=pl.BlockSpec((1, 1, 1), lambda i: (i, 0, 0)),
        ),
        compiler_params=pltpu.CompilerParams(
            dimension_semantics=("parallel",),   # independent blocks -> megacore on v7x
            vmem_limit_bytes=32 << 20,           # explicit, safe on v5e/v6e/v7x
        ),
    )(x, t2d)

    # Tiny per-block partial-sum reduce + mean done outside the kernel.
    return jnp.sum(partials) / jnp.float32(n)


def _reference(x, target, gamma=GAMMA):
    logpt = jax.nn.log_softmax(x.astype(jnp.float32), axis=1)
    pt = jnp.exp(logpt)
    logpt = (1.0 - pt) ** gamma * logpt
    picked = jnp.take_along_axis(logpt, target.astype(jnp.int32)[:, None], axis=1)[:, 0]
    return -jnp.mean(picked)


if __name__ == "__main__":
    key = jax.random.PRNGKey(0)
    k1, k2, k3, k4, k5, k6 = jax.random.split(key, 6)

    # Primary case: [N, C] logits, class-index targets.
    N, C = 16, 32
    x = jax.random.normal(k1, (N, C), dtype=jnp.float32)
    target = jax.random.randint(k2, (N,), 0, C, dtype=jnp.int32)
    loss = jax.block_until_ready(multiclass_focal_loss(x, target))
    ref = jax.block_until_ready(_reference(x, target))
    assert jnp.allclose(loss, ref, atol=1e-5, rtol=1e-5), (loss, ref)

    # Ragged N (remainder masking) + multi-block grid (grid > 1).
    N2, C2 = 100, 24
    x2 = jax.random.normal(k3, (N2, C2), dtype=jnp.float32)
    t2 = jax.random.randint(k4, (N2,), 0, C2, dtype=jnp.int32)
    loss2 = jax.block_until_ready(multiclass_focal_loss(x2, t2, block_n=32))
    ref2 = jax.block_until_ready(_reference(x2, t2))
    assert jnp.allclose(loss2, ref2, atol=1e-5, rtol=1e-5), (loss2, ref2)

    # bf16 logits (kernel and reference both promote to f32 internally).
    N3, C3 = 48, 40
    x3 = jax.random.normal(k5, (N3, C3), dtype=jnp.bfloat16)
    t3 = jax.random.randint(k6, (N3,), 0, C3, dtype=jnp.int32)
    loss3 = jax.block_until_ready(multiclass_focal_loss(x3, t3))
    ref3 = jax.block_until_ready(_reference(x3, t3))
    assert jnp.allclose(loss3, ref3, atol=1e-4, rtol=1e-4), (loss3, ref3)

    # TODO(synk): torch nll_loss raises on out-of-range targets; here such rows
    # silently contribute 0 at the gather instead of erroring.
    print("KERNEL_OK")
</pallas_src>

<mosaic_0001>
module attributes {stable_mosaic.version = 11 : i64} {
  func.func @_focal_loss_kernel(%arg0: i32, %arg1: memref<16x32xf32, #tpu.memory_space<vmem>>, %arg2: memref<16x1xi32, #tpu.memory_space<vmem>>, %arg3: memref<1x1x1xf32, #tpu.memory_space<vmem>>) attributes {dimension_semantics = [#tpu.dimension_semantics<parallel>], iteration_bounds = array<i64: 1>, scalar_prefetch = 0 : i64, scratch_operands = 0 : i64, tpu.core_type = #tpu.core_type<tc>, window_params = [{transform_indices = @transform_0, window_bounds = array<i64: 16, 32>}, {transform_indices = @transform_1, window_bounds = array<i64: 16, 1>}, {transform_indices = @transform_2, window_bounds = array<i64: 1, 1, 1>}]} {
    %c0 = arith.constant 0 : index
    %c0_0 = arith.constant 0 : index
    %0 = vector.load %arg1[%c0, %c0_0] : memref<16x32xf32, #tpu.memory_space<vmem>>, vector<16x32xf32>
    %c0_1 = arith.constant 0 : index
    %c0_2 = arith.constant 0 : index
    %1 = vector.load %arg2[%c0_1, %c0_2] : memref<16x1xi32, #tpu.memory_space<vmem>>, vector<16x1xi32>
    %cst = arith.constant dense<0xFF800000> : vector<16xf32>
    %2 = vector.multi_reduction <maximumf>, %0, %cst [1] : vector<16x32xf32> to vector<16xf32>
    %3 = vector.shape_cast %2 : vector<16xf32> to vector<16x1xf32>
    %4 = vector.broadcast %3 : vector<16x1xf32> to vector<16x32xf32>
    %5 = arith.subf %0, %4 : vector<16x32xf32>
    %6 = math.exp %5 : vector<16x32xf32>
    %cst_3 = arith.constant dense<0.000000e+00> : vector<16xf32>
    %7 = vector.multi_reduction <add>, %6, %cst_3 [1] : vector<16x32xf32> to vector<16xf32>
    %8 = vector.shape_cast %7 : vector<16xf32> to vector<16x1xf32>
    %9 = math.log %8 : vector<16x1xf32>
    %10 = tpu.iota {dimensions = array<i32: 1>} : vector<16x32xi32>
    %11 = vector.broadcast %1 : vector<16x1xi32> to vector<16x32xi32>
    %12 = arith.cmpi eq, %10, %11 : vector<16x32xi32>
    %cst_4 = arith.constant 0.000000e+00 : f32
    %13 = vector.broadcast %cst_4 : f32 to vector<16x32xf32>
    %14 = arith.select %12, %5, %13 : vector<16x32xi1>, vector<16x32xf32>
    %cst_5 = arith.constant dense<0.000000e+00> : vector<16xf32>
    %15 = vector.multi_reduction <add>, %14, %cst_5 [1] : vector<16x32xf32> to vector<16xf32>
    %16 = vector.shape_cast %15 : vector<16xf32> to vector<16x1xf32>
    %17 = arith.subf %16, %9 : vector<16x1xf32>
    %18 = math.exp %17 : vector<16x1xf32>
    %cst_6 = arith.constant 1.000000e+00 : f32
    %19 = vector.broadcast %cst_6 : f32 to vector<16x1xf32>
    %20 = arith.subf %19, %18 : vector<16x1xf32>
    %21 = arith.mulf %20, %20 : vector<16x1xf32>
    %22 = arith.mulf %21, %17 : vector<16x1xf32>
    %23 = vector.shape_cast %22 : vector<16x1xf32> to vector<1x16x1xf32>
    %cst_7 = arith.constant dense<0.000000e+00> : vector<1xf32>
    %24 = vector.multi_reduction <add>, %23, %cst_7 [1, 2] : vector<1x16x1xf32> to vector<1xf32>
    %25 = vector.shape_cast %24 : vector<1xf32> to vector<1x1x1xf32>
    %26 = vector.extract %25[0, 0, 0] : f32 from vector<1x1x1xf32>
    %27 = vector.broadcast %26 : f32 to vector<1x1xf32>
    %cst_8 = arith.constant 0.000000e+00 : f32
    %28 = vector.broadcast %cst_8 : f32 to vector<1x1xf32>
    %29 = arith.subf %28, %27 : vector<1x1xf32>
    %c0_9 = arith.constant 0 : index
    %c0_10 = arith.constant 0 : index
    %c0_11 = arith.constant 0 : index
    %30 = vector.load %arg3[%c0_9, %c0_10, %c0_11] : memref<1x1x1xf32, #tpu.memory_space<vmem>>, vector<1x1x1xf32>
    %31 = vector.shape_cast %30 : vector<1x1x1xf32> to vector<1x1xf32>
    %32 = vector.shape_cast %29 : vector<1x1xf32> to vector<1x1x1xf32>
    tpu.vector_store %arg3[%c0_9, %c0_10, %c0_11], %32 {strides = array<i32>} : memref<1x1x1xf32, #tpu.memory_space<vmem>>, vector<1x1x1xf32>,
    return
  }
  func.func @transform_0(%arg0: i32) -> (i32, i32) {
    %c0_i32 = arith.constant 0 : i32
    %c0_i32_0 = arith.constant 0 : i32
    return %arg0, %c0_i32 : i32, i32
  }
  func.func @transform_1(%arg0: i32) -> (i32, i32) {
    %c0_i32 = arith.constant 0 : i32
    %c0_i32_0 = arith.constant 0 : i32
    return %arg0, %c0_i32 : i32, i32
  }
  func.func @transform_2(%arg0: i32) -> (i32, i32, i32) {
    %c0_i32 = arith.constant 0 : i32
    %c0_i32_0 = arith.constant 0 : i32
    %c0_i32_1 = arith.constant 0 : i32
    return %arg0, %c0_i32, %c0_i32_0 : i32, i32, i32
  }
}

</mosaic_0001>

<bundles_post_ra>
// kernel: tpu_custom_call.1
= control target key start
LH: loop header
LB: loop body
LE: loop exit
PB: predicated region body
PF: predicated region fallthrough
CT: control target
= control target key end

     0   :  { %vm16_vm0 = vcmask 261120   ;;  %v142_v4 = vmov 0   ;;  %s189_s0 = inlined_call_operand.vmem [shape: f32[16,32], index: 0, kind: input, shape index: {}]   ;;  %s190_s1 = inlined_call_operand.vmem [shape: s32[16,1], index: 1, kind: input, shape index: {}]   ;;  %s191_s2 = inlined_call_operand.hbm [shape: f32[1,1,1], index: 2, kind: output, shape index: {}]  }
   0x1   :  { %v12_v0 = vld [vmem:[%s189_s0] sm:$0xff]  ;;  %v13_v1 = vld [vmem:[%s189_s0 + $0x8] sm:$0xff]  ;;  %104 = vset.pattern.permute.xlu1 %v142_v4  ;;  %105 = vset.pattern.permute.xlu0 %v142_v4 }
   0x2   :  { %v14_v2 = vld [vmem:[%s190_s1] sm:$0xff]  ;;  %v17_v3 = vsel %vm16_vm0, %v12_v0, -inf }
   0x3   :  { %7 = vsyncpa [#allocation3], 0  ;;  %18 = vmax.xlane.f32.xlu0 %v17_v3  ;;  %42 = vperm.xlu1 %104, %v14_v2   ;;  %v20_v5 = vsel %vm16_vm0, %v13_v1, -inf  ;;  %v15_v6 = vld [vmem:[%s190_s1 + $0x8] sm:$0xff]  ;;  %v39_v12 = vlaneseq  ;;  %vm69_vm3 = vcmask 7168   ;;  %s143_s0 = smov [#allocation2]  }
   0x4   :  { %s92_s1 = sshll.u32 %s143_s0, 4  ;;  %vm84_vm4 = vcmask 0   ;;  %s93_s1 = int_to_ptr.vmem [resolvable:$true] %s92_s1 }
   0x5   :  { %v40_v15 = vand.u32 127, %v39_v12  ;;  %s118_s18 = scalar_lea.vmem %s93_s1, 16  ;;  %s122_s19 = scalar_lea.vmem %s93_s1, 32 }
   0x6   :  { %p119_p0 = scmp.ne.s32.totalorder %s93_s1, %s118_s18  ;;  %p123_p1 = scmp.lt.s32.totalorder %s93_s1, %s93_s1 }
   0x7   :  { %21 = vmax.xlane.f32.xlu0 %v20_v5  ;;  %45 = vperm.xlu1 %104, %v15_v6   ;;  %p124_p2 = scmp.lt.s32.totalorder %s122_s19, %s118_s18 }
   0x9   :  { %p125_p3 = por %p124_p2, %p123_p1 }
   0xb   :  { %p126_p4 = pnand %p125_p3, %p119_p0 }
  0x82   :  { %v43_v14 = vpop.permute.xlu1 %42 }
  0x83   :  { %vm47_vm1 = vcmp.eq.s32.totalorder %v40_v15, %v43_v14 }
  0x86   :  { %v46_v17 = vpop.permute.xlu1 %45 }
  0x87   :  { %vm48_vm2 = vcmp.eq.s32.totalorder %v40_v15, %v46_v17 }
  0x90   :  { %v19_v7 = vpop.xlane.xlu0 %18 }
  0x91   :  { %v23_v8 = vsub.f32 %v12_v0, %v19_v7 }
  0x93   :  { %v25_v9 = vmul.f32 1.442695, %v23_v8  ;;  %v49_v19 = vsel %vm47_vm1, %v23_v8, 0.0 }
  0x94   :  { %v22_v10 = vpop.xlane.xlu0 %21  ;;  %v51_v21 = vsel %vm16_vm0, %v49_v19, 0.0 }
  0x95   :  { %106 = vpow2.f32 %v25_v9  ;;  %v24_v11 = vsub.f32 %v13_v1, %v22_v10 }
  0x97   :  { %v27_v13 = vmul.f32 1.442695, %v24_v11  ;;  %v50_v23 = vsel %vm48_vm2, %v24_v11, 0.0 }
  0x98   :  { %v54_v24 = vsel %vm16_vm0, %v50_v23, 0.0 }
  0x99   :  { %108 = vpow2.f32 %v27_v13 }
  0x9f   :  { %v107_v16 = vpop.eup %106 }
  0xa0   :  { %v29_v18 = vsel %vm16_vm0, %v107_v16, 0.0 }
  0xa1   :  { %30 = vadd.xlane.f32.xlu0 %v29_v18 }
  0xa3   :  { %v109_v20 = vpop.eup %108 }
  0xa4   :  { %v32_v22 = vsel %vm16_vm0, %v109_v20, 0.0 }
  0xa5   :  { %52 = vadd.xlane.f32.xlu0 %v51_v21  ;;  %33 = vadd.xlane.f32.xlu1 %v32_v22 }
  0xa9   :  { %55 = vadd.xlane.f32.xlu0 %v54_v24 }
 0x12e   :  { %v31_v25 = vpop.xlane.xlu0 %30 }
 0x12f   :  { %110 = vlog2.f32 %v31_v25 }
 0x132   :  { %v34_v26 = vpop.xlane.xlu1 %33  ;;  %v53_v28 = vpop.xlane.xlu0 %52 }
 0x133   :  { %112 = vlog2.f32 %v34_v26 }
 0x136   :  { %v56_v34 = vpop.xlane.xlu0 %55 }
 0x139   :  { %v111_v27 = vpop.eup %110 }
 0x13a   :  { %v36_v29 = vmul.f32 0.6931472, %v111_v27 }
 0x13c   :  { %v57_v30 = vsub.f32 %v53_v28, %v36_v29 }
 0x13d   :  { %v113_v31 = vpop.eup %112 }
 0x13e   :  { %v59_v32 = vmul.f32 1.442695, %v57_v30  ;;  %v38_v33 = vmul.f32 0.6931472, %v113_v31 }
 0x140   :  { %114 = vpow2.f32 %v59_v32  ;;  %v58_v35 = vsub.f32 %v56_v34, %v38_v33 }
 0x142   :  { %v61_v36 = vmul.f32 1.442695, %v58_v35 }
 0x144   :  { %116 = vpow2.f32 %v61_v36 }
 0x14a   :  { %v115_v37 = vpop.eup %114 }
 0x14b   :  { %v63_v38 = vsub.f32 1.0, %v115_v37 }
 0x14d   :  { %v65_v39 = vmul.f32 %v63_v38, %v63_v38 }
 0x14e   :  { %v117_v40 = vpop.eup %116 }
 0x14f   :  { %v64_v41 = vsub.f32 1.0, %v117_v40  ;;  %v67_v42 = vmul.f32 %v65_v39, %v57_v30 }
 0x151   :  { %v66_v43 = vmul.f32 %v64_v41, %v64_v41  ;;  %v70_v45 = vsel %vm69_vm3, %v67_v42, 0.0 }
 0x153   :  { %v68_v44 = vmul.f32 %v66_v43, %v58_v35 }
 0x155   :  { %v71_v46 = vsel %vm69_vm3, %v68_v44, 0.0 }
 0x156   :  { %v72_v47 = vadd.f32 %v71_v46, %v70_v45 }
 0x158   :  { %73 = vadd.xlane.f32.xlu0 %v72_v47 }
 0x1e5   :  { %v74_v48 = vpop.xlane.xlu0 %73 }
 0x1e6   :  { %v75_v49 = vrot.slane %v74_v48, 4 }
 0x1e8   :  { %v76_v50 = vadd.f32 %v75_v49, %v74_v48 }
 0x1ea   :  { %v77_v51 = vrot.slane %v76_v50, 2 }
 0x1ec   :  { %v78_v52 = vadd.f32 %v77_v51, %v76_v50 }
 0x1ee   :  { %v79_v53 = vrot.slane %v78_v52, 1 }
 0x1f0   :  { %v80_v54 = vadd.f32 %v79_v53, %v78_v52 }
 0x1f2   :  { %100 = vpush %v80_v54 }
 0x223   :  { %s101_s17 = spop %100 }
 0x224   :  { %v82_v55 = vstv %s101_s17 }
 0x225   :  { %v83_v56 = vsub.f32 0.0, %v82_v55 }
 0x227   :  { %85 = vst.msk [vmem:[#allocation2] sm:$0x1] %vm84_vm4, %v83_v56 }
 0x228   :  { %129 = shalt.err (!%p126_p4)
}
 0x229   :  { %s130_s22 = scalar_lea.hbm %s191_s2, 16 }
 0x22a   :  { %p131_p5 = scmp.ne.s32.totalorder %s191_s2, %s130_s22  ;;  %p134_p6 = scmp.lt.u32.totalorder %s130_s22, %s191_s2 }
 0x22c   :  { %p136_p7 = pnand %p134_p6, %p131_p5 }
 0x22e   :  { %139 = shalt.err (!%p136_p7)
}
 0x22f   :  { %95 = dma.vmem_to_hbm [thread:$0]  %s93_s1, 16, %s191_s2, [#allocation3]  }
 0x230   :  { %140 = dma.done.wait [#allocation3], 16  }
 0x231   :  { %141 = vsyncadd [#allocation3], 4294967280 }
 0x232   :  { %99 = vsyncpa [#allocation3], 1 }

</bundles_post_ra>
